<compile_context>
chip_gen: v7x
topology: tpu7x:2x2x1
jax: 0.10.0
libtpu: 0.0.40
codegen_flags: <defaults>
</compile_context>

<pallas_src>
import functools

import jax
import jax.numpy as jnp
from jax.experimental import pallas as pl
from jax.experimental.pallas import tpu as pltpu


def _round_up(x, m):
    return ((x + m - 1) // m) * m


def _cdiv(a, b):
    return -(-a // b)


def _choose_tile(M, tm):
    """Pick a 128-aligned row tile so the grid has >=2 (preferably even) steps."""
    m128 = _round_up(max(M, 1), 128)
    # Cap the tile at half the (padded) rows so >=2 steps exist when possible,
    # letting both v7x TensorCores work (no-op on 1-TC chips).
    cap = _round_up(_cdiv(m128, 2), 128) if m128 >= 256 else m128
    tm_eff = _round_up(max(128, min(tm, cap)), 128)
    steps = _cdiv(m128, tm_eff)
    if 1 < steps <= 16 and steps % 2:
        steps += 1                                     # balance across 2 TCs
        tm_eff = _round_up(_cdiv(m128, steps), 128)
    grid = _cdiv(m128, tm_eff)
    return tm_eff, grid * tm_eff, grid


def _decoder_kernel(num_hidden, compute_dtype, x_ref, *refs):
    """refs = [w0, b0, ..., w_{L-1}, b_{L-1}, wd8, bd8, o_ref]

    w_i:  (in, Hm) compute_dtype, b_i: (1, Hm) f32
    wd8:  (8, Hm) compute_dtype -- row 0 = w_out[:,1] - w_out[:,0] (class diff)
    bd8:  (8, 1)  f32           -- row 0 = b_out[1] - b_out[0]
    o_ref: (2, tm)              -- lane-dense transposed log-probs
    """
    o_ref = refs[-1]
    prefs = refs[:-1]

    h = x_ref[...]

    # Hidden layers: Linear -> ReLU (static unroll; L small & fixed).
    for i in range(num_hidden):
        w = prefs[2 * i][...]
        b = prefs[2 * i + 1][...]
        h = jnp.dot(h.astype(compute_dtype), w,
                    preferred_element_type=jnp.float32) + b
        h = jnp.maximum(h, 0.0)

    wd8 = prefs[2 * num_hidden][...]       # (8, Hm)
    bd8 = prefs[2 * num_hidden + 1][...]   # (8, 1)

    # d^T = wd8 @ h^T  -> (8, tm) lane-dense; only row 0 carries the class-diff
    # logit (rows 1-7 zero weights; 8 sublanes is the minimum granularity anyway).
    d8 = jax.lax.dot_general(
        wd8, h.astype(compute_dtype), (((1,), (1,)), ((), ())),
        preferred_element_type=jnp.float32) + bd8
    d = d8[0:1, :]                          # (1, tm): l1 - l0 per row

    # Exact 2-class log_softmax via stable softplus of the class difference:
    #   lp0 = -softplus(d),  lp1 = -softplus(-d)
    common = jnp.log1p(jnp.exp(-jnp.abs(d)))        # EUP work rides a free slot
    o_ref[0:1, :] = (-(jnp.maximum(d, 0.0) + common)).astype(o_ref.dtype)
    o_ref[1:2, :] = (-(jnp.maximum(-d, 0.0) + common)).astype(o_ref.dtype)


def classification_decoder_forward(h_e, params, *, tm=4096,
                                   compute_dtype=jnp.bfloat16):
    """
    h_e:    (B, N, N, H) float32 (or bf16 if the upstream encoder emits bf16)
    params: list of (w, b); hidden layers w:(in, Hm), final layer w:(Hm, 2), b:(2,)
    returns (B, N, N, 2) float32 log-probabilities.
    """
    B, N, N2, H = h_e.shape
    assert N == N2
    M = B * N * N
    x = h_e.reshape(M, H)

    tm_eff, M_pad, grid = _choose_tile(M, tm)
    if M_pad != M:
        x = jnp.pad(x, ((0, M_pad - M), (0, 0)))

    hidden = params[:-1]
    w_out, b_out = params[-1]
    Hm = w_out.shape[0]
    L = len(hidden)

    # Final Linear(Hm, 2) + log_softmax reduced to a single difference row.
    w_diff = (w_out[:, 1] - w_out[:, 0]).astype(jnp.float32)
    b_diff = (b_out[1] - b_out[0]).astype(jnp.float32)
    wd8 = jnp.zeros((8, Hm), jnp.float32).at[0].set(w_diff).astype(compute_dtype)
    bd8 = jnp.zeros((8, 1), jnp.float32).at[0, 0].set(b_diff)

    flat_params = []
    param_specs = []
    for (w, b) in hidden:
        flat_params.append(w.astype(compute_dtype))
        param_specs.append(pl.BlockSpec(w.shape, lambda i: (0, 0)))
        flat_params.append(b.reshape(1, -1).astype(jnp.float32))
        param_specs.append(pl.BlockSpec((1, b.shape[0]), lambda i: (0, 0)))
    flat_params.extend([wd8, bd8])
    param_specs.append(pl.BlockSpec(wd8.shape, lambda i: (0, 0)))
    param_specs.append(pl.BlockSpec(bd8.shape, lambda i: (0, 0)))

    kernel = functools.partial(_decoder_kernel, L, compute_dtype)

    # Advisory cost estimate so XLA schedules the custom call sensibly.
    flops = 2 * M_pad * (H * Hm + max(L - 1, 0) * Hm * Hm + 8 * Hm)
    param_bytes = sum(int(p.size) * jnp.dtype(p.dtype).itemsize for p in flat_params)
    bytes_accessed = (M_pad * H * jnp.dtype(x.dtype).itemsize
                      + 2 * M_pad * 4 + param_bytes)
    cost = pl.CostEstimate(flops=int(flops), transcendentals=int(2 * M_pad),
                           bytes_accessed=int(bytes_accessed))

    # VMEM budget from the chosen tile: 2x-buffered I/O + params + activation headroom.
    in_bytes = tm_eff * H * jnp.dtype(x.dtype).itemsize
    out_bytes = 2 * tm_eff * 4
    act_bytes = tm_eff * max(Hm, H) * 4 * 4
    vmem_limit = 2 * (in_bytes + out_bytes + param_bytes) + act_bytes + (4 << 20)
    vmem_limit = int(max(16 << 20, min(vmem_limit, 48 << 20)))

    out_t = pl.pallas_call(
        kernel,
        out_shape=jax.ShapeDtypeStruct((2, M_pad), jnp.float32),
        grid_spec=pltpu.PrefetchScalarGridSpec(
            num_scalar_prefetch=0,
            grid=(grid,),
            in_specs=[pl.BlockSpec((tm_eff, H), lambda i: (i, 0))] + param_specs,
            out_specs=pl.BlockSpec((2, tm_eff), lambda i: (0, i)),
        ),
        compiler_params=pltpu.CompilerParams(
            dimension_semantics=("parallel",),
            vmem_limit_bytes=vmem_limit,
        ),
        cost_estimate=cost,
    )(x, *flat_params)

    # TODO(synk): consumers that only gather one class (e.g. NLL) can use the
    # (2, M) class-major layout directly and skip this transpose.
    out = out_t[:, :M].T
    return out.reshape(B, N, N, 2)


def init_params(key, hidden_dim, hidden_dim_mlp, num_layers_mlp):
    """Deterministic synthetic parameters matching the PyTorch module's shapes."""
    params = []
    dims_in = [hidden_dim] + [hidden_dim_mlp] * (num_layers_mlp - 1)
    for i in range(num_layers_mlp):
        key, kw, kb = jax.random.split(key, 3)
        fan_in = dims_in[i]
        w = jax.random.normal(kw, (fan_in, hidden_dim_mlp), jnp.float32) * (1.0 / jnp.sqrt(fan_in))
        b = jax.random.normal(kb, (hidden_dim_mlp,), jnp.float32) * 0.01
        params.append((w, b))
    key, kw, kb = jax.random.split(key, 3)
    w_out = jax.random.normal(kw, (hidden_dim_mlp, 2), jnp.float32) * (1.0 / jnp.sqrt(hidden_dim_mlp))
    b_out = jax.random.normal(kb, (2,), jnp.float32) * 0.01
    params.append((w_out, b_out))
    return params


def reference_forward(h_e, params):
    """Pure-JAX reference matching the PyTorch module."""
    h = h_e
    for (w, b) in params[:-1]:
        h = jnp.maximum(h @ w + b, 0.0)
    w_out, b_out = params[-1]
    logits = h @ w_out + b_out
    return jax.nn.log_softmax(logits, axis=-1)


if __name__ == "__main__":
    hidden_dim = 32
    hidden_dim_mlp = 64
    num_layers_mlp = 2

    key = jax.random.PRNGKey(0)
    key, k_x1, k_x2, k_x3 = jax.random.split(key, 4)
    params = init_params(key, hidden_dim, hidden_dim_mlp, num_layers_mlp)

    # Test 1: small shape, single-tile grid, f32 compute (tight tolerance).
    h_e1 = jax.random.normal(k_x1, (2, 8, 8, hidden_dim), jnp.float32)
    out1 = jax.block_until_ready(
        classification_decoder_forward(h_e1, params, compute_dtype=jnp.float32))
    ref1 = reference_forward(h_e1, params)
    assert out1.shape == (2, 8, 8, 2), out1.shape
    assert jnp.allclose(out1, ref1, atol=1e-5, rtol=1e-5), float(jnp.max(jnp.abs(out1 - ref1)))

    # Test 2: node count that does NOT tile-align (exercises row padding), f32.
    h_e2 = jax.random.normal(k_x2, (2, 5, 5, hidden_dim), jnp.float32)
    out2 = jax.block_until_ready(
        classification_decoder_forward(h_e2, params, compute_dtype=jnp.float32))
    ref2 = reference_forward(h_e2, params)
    assert out2.shape == (2, 5, 5, 2), out2.shape
    assert jnp.allclose(out2, ref2, atol=1e-5, rtol=1e-5), float(jnp.max(jnp.abs(out2 - ref2)))

    # Test 3: multi-step grid (small tm forces >=2 balanced steps), f32.
    h_e3 = jax.random.normal(k_x3, (2, 16, 16, hidden_dim), jnp.float32)
    out3 = jax.block_until_ready(
        classification_decoder_forward(h_e3, params, tm=256, compute_dtype=jnp.float32))
    ref3 = reference_forward(h_e3, params)
    assert out3.shape == (2, 16, 16, 2), out3.shape
    assert jnp.allclose(out3, ref3, atol=1e-5, rtol=1e-5), float(jnp.max(jnp.abs(out3 - ref3)))

    # Test 4: default bf16 MXU compute (loose tolerance).
    out4 = jax.block_until_ready(classification_decoder_forward(h_e1, params))
    assert out4.shape == (2, 8, 8, 2), out4.shape
    assert jnp.all(jnp.isfinite(out4))
    assert jnp.allclose(out4, ref1, atol=0.15, rtol=0.1), float(jnp.max(jnp.abs(out4 - ref1)))

    print("KERNEL_OK")
</pallas_src>

<mosaic_0001>
module attributes {stable_mosaic.version = 11 : i64} {
  func.func @_decoder_kernel(%arg0: i32, %arg1: memref<128x32xf32, #tpu.memory_space<vmem>>, %arg2: memref<32x64xf32, #tpu.memory_space<vmem>>, %arg3: memref<1x64xf32, #tpu.memory_space<vmem>>, %arg4: memref<64x64xf32, #tpu.memory_space<vmem>>, %arg5: memref<1x64xf32, #tpu.memory_space<vmem>>, %arg6: memref<8x64xf32, #tpu.memory_space<vmem>>, %arg7: memref<8x1xf32, #tpu.memory_space<vmem>>, %arg8: memref<2x128xf32, #tpu.memory_space<vmem>>) attributes {dimension_semantics = [#tpu.dimension_semantics<parallel>], iteration_bounds = array<i64: 1>, scalar_prefetch = 0 : i64, scratch_operands = 0 : i64, tpu.core_type = #tpu.core_type<tc>, window_params = [{transform_indices = @transform_0, window_bounds = array<i64: 128, 32>}, {pipeline_mode = #tpu.pipeline_mode<synchronous>, transform_indices = @transform_1, window_bounds = array<i64: 32, 64>}, {pipeline_mode = #tpu.pipeline_mode<synchronous>, transform_indices = @transform_2, window_bounds = array<i64: 1, 64>}, {pipeline_mode = #tpu.pipeline_mode<synchronous>, transform_indices = @transform_3, window_bounds = array<i64: 64, 64>}, {pipeline_mode = #tpu.pipeline_mode<synchronous>, transform_indices = @transform_4, window_bounds = array<i64: 1, 64>}, {pipeline_mode = #tpu.pipeline_mode<synchronous>, transform_indices = @transform_5, window_bounds = array<i64: 8, 64>}, {pipeline_mode = #tpu.pipeline_mode<synchronous>, transform_indices = @transform_6, window_bounds = array<i64: 8, 1>}, {transform_indices = @transform_7, window_bounds = array<i64: 2, 128>}]} {
    %c0 = arith.constant 0 : index
    %c0_0 = arith.constant 0 : index
    %0 = vector.load %arg1[%c0, %c0_0] : memref<128x32xf32, #tpu.memory_space<vmem>>, vector<128x32xf32>
    %c0_1 = arith.constant 0 : index
    %c0_2 = arith.constant 0 : index
    %1 = vector.load %arg2[%c0_1, %c0_2] : memref<32x64xf32, #tpu.memory_space<vmem>>, vector<32x64xf32>
    %c0_3 = arith.constant 0 : index
    %c0_4 = arith.constant 0 : index
    %2 = vector.load %arg3[%c0_3, %c0_4] : memref<1x64xf32, #tpu.memory_space<vmem>>, vector<1x64xf32>
    %cst = arith.constant dense<0.000000e+00> : vector<128x64xf32>
    %3 = tpu.matmul %0, %1, %cst {dimension_numbers = #tpu.dot_dimension_numbers<[1], [0], [0], [1], [0, 0, 1, 1], [], []>} : vector<128x32xf32>, vector<32x64xf32>, vector<128x64xf32> -> vector<128x64xf32>
    %4 = vector.broadcast %2 : vector<1x64xf32> to vector<128x64xf32>
    %5 = arith.addf %3, %4 : vector<128x64xf32>
    %cst_5 = arith.constant 0.000000e+00 : f32
    %6 = vector.broadcast %cst_5 : f32 to vector<128x64xf32>
    %7 = arith.maximumf %5, %6 : vector<128x64xf32>
    %c0_6 = arith.constant 0 : index
    %c0_7 = arith.constant 0 : index
    %8 = vector.load %arg4[%c0_6, %c0_7] : memref<64x64xf32, #tpu.memory_space<vmem>>, vector<64x64xf32>
    %c0_8 = arith.constant 0 : index
    %c0_9 = arith.constant 0 : index
    %9 = vector.load %arg5[%c0_8, %c0_9] : memref<1x64xf32, #tpu.memory_space<vmem>>, vector<1x64xf32>
    %cst_10 = arith.constant dense<0.000000e+00> : vector<128x64xf32>
    %10 = tpu.matmul %7, %8, %cst_10 {dimension_numbers = #tpu.dot_dimension_numbers<[1], [0], [0], [1], [0, 0, 1, 1], [], []>} : vector<128x64xf32>, vector<64x64xf32>, vector<128x64xf32> -> vector<128x64xf32>
    %11 = vector.broadcast %9 : vector<1x64xf32> to vector<128x64xf32>
    %12 = arith.addf %10, %11 : vector<128x64xf32>
    %cst_11 = arith.constant 0.000000e+00 : f32
    %13 = vector.broadcast %cst_11 : f32 to vector<128x64xf32>
    %14 = arith.maximumf %12, %13 : vector<128x64xf32>
    %c0_12 = arith.constant 0 : index
    %c0_13 = arith.constant 0 : index
    %15 = vector.load %arg6[%c0_12, %c0_13] : memref<8x64xf32, #tpu.memory_space<vmem>>, vector<8x64xf32>
    %c0_14 = arith.constant 0 : index
    %c0_15 = arith.constant 0 : index
    %16 = vector.load %arg7[%c0_14, %c0_15] : memref<8x1xf32, #tpu.memory_space<vmem>>, vector<8x1xf32>
    %cst_16 = arith.constant dense<0.000000e+00> : vector<8x128xf32>
    %17 = tpu.matmul %15, %14, %cst_16 {dimension_numbers = #tpu.dot_dimension_numbers<[1], [1], [0], [0], [0, 0, 1, 0], [], []>} : vector<8x64xf32>, vector<128x64xf32>, vector<8x128xf32> -> vector<8x128xf32>
    %18 = vector.broadcast %16 : vector<8x1xf32> to vector<8x128xf32>
    %19 = arith.addf %17, %18 : vector<8x128xf32>
    %20 = vector.extract_strided_slice %19 {offsets = [0, 0], sizes = [1, 128], strides = [1, 1]} : vector<8x128xf32> to vector<1x128xf32>
    %21 = math.absf %20 : vector<1x128xf32>
    %cst_17 = arith.constant 0.000000e+00 : f32
    %22 = vector.broadcast %cst_17 : f32 to vector<1x128xf32>
    %23 = arith.subf %22, %21 : vector<1x128xf32>
    %24 = math.exp %23 : vector<1x128xf32>
    %25 = math.log1p %24 : vector<1x128xf32>
    %cst_18 = arith.constant 0.000000e+00 : f32
    %26 = vector.broadcast %cst_18 : f32 to vector<1x128xf32>
    %27 = arith.maximumf %20, %26 : vector<1x128xf32>
    %28 = arith.addf %27, %25 : vector<1x128xf32>
    %cst_19 = arith.constant 0.000000e+00 : f32
    %29 = vector.broadcast %cst_19 : f32 to vector<1x128xf32>
    %30 = arith.subf %29, %28 : vector<1x128xf32>
    %c0_20 = arith.constant 0 : index
    %c0_21 = arith.constant 0 : index
    %31 = vector.load %arg8[%c0_20, %c0_21] : memref<2x128xf32, #tpu.memory_space<vmem>>, vector<1x128xf32>
    tpu.vector_store %arg8[%c0_20, %c0_21], %30 {strides = array<i32>} : memref<2x128xf32, #tpu.memory_space<vmem>>, vector<1x128xf32>,
    %cst_22 = arith.constant 0.000000e+00 : f32
    %32 = vector.broadcast %cst_22 : f32 to vector<1x128xf32>
    %33 = arith.subf %32, %20 : vector<1x128xf32>
    %cst_23 = arith.constant 0.000000e+00 : f32
    %34 = vector.broadcast %cst_23 : f32 to vector<1x128xf32>
    %35 = arith.maximumf %33, %34 : vector<1x128xf32>
    %36 = arith.addf %35, %25 : vector<1x128xf32>
    %cst_24 = arith.constant 0.000000e+00 : f32
    %37 = vector.broadcast %cst_24 : f32 to vector<1x128xf32>
    %38 = arith.subf %37, %36 : vector<1x128xf32>
    %c1 = arith.constant 1 : index
    %c0_25 = arith.constant 0 : index
    %39 = vector.load %arg8[%c1, %c0_25] : memref<2x128xf32, #tpu.memory_space<vmem>>, vector<1x128xf32>
    tpu.vector_store %arg8[%c1, %c0_25], %38 {strides = array<i32>} : memref<2x128xf32, #tpu.memory_space<vmem>>, vector<1x128xf32>,
    return
  }
  func.func @transform_0(%arg0: i32) -> (i32, i32) {
    %c0_i32 = arith.constant 0 : i32
    %c0_i32_0 = arith.constant 0 : i32
    return %arg0, %c0_i32 : i32, i32
  }
  func.func @transform_1(%arg0: i32) -> (i32, i32) {
    %c0_i32 = arith.constant 0 : i32
    %c0_i32_0 = arith.constant 0 : i32
    %c0_i32_1 = arith.constant 0 : i32
    return %c0_i32, %c0_i32_0 : i32, i32
  }
  func.func @transform_2(%arg0: i32) -> (i32, i32) {
    %c0_i32 = arith.constant 0 : i32
    %c0_i32_0 = arith.constant 0 : i32
    %c0_i32_1 = arith.constant 0 : i32
    return %c0_i32, %c0_i32_0 : i32, i32
  }
  func.func @transform_3(%arg0: i32) -> (i32, i32) {
    %c0_i32 = arith.constant 0 : i32
    %c0_i32_0 = arith.constant 0 : i32
    %c0_i32_1 = arith.constant 0 : i32
    return %c0_i32, %c0_i32_0 : i32, i32
  }
  func.func @transform_4(%arg0: i32) -> (i32, i32) {
    %c0_i32 = arith.constant 0 : i32
    %c0_i32_0 = arith.constant 0 : i32
    %c0_i32_1 = arith.constant 0 : i32
    return %c0_i32, %c0_i32_0 : i32, i32
  }
  func.func @transform_5(%arg0: i32) -> (i32, i32) {
    %c0_i32 = arith.constant 0 : i32
    %c0_i32_0 = arith.constant 0 : i32
    %c0_i32_1 = arith.constant 0 : i32
    return %c0_i32, %c0_i32_0 : i32, i32
  }
  func.func @transform_6(%arg0: i32) -> (i32, i32) {
    %c0_i32 = arith.constant 0 : i32
    %c0_i32_0 = arith.constant 0 : i32
    %c0_i32_1 = arith.constant 0 : i32
    return %c0_i32, %c0_i32_0 : i32, i32
  }
  func.func @transform_7(%arg0: i32) -> (i32, i32) {
    %c0_i32 = arith.constant 0 : i32
    %c0_i32_0 = arith.constant 0 : i32
    return %c0_i32, %arg0 : i32, i32
  }
}

</mosaic_0001>

<bundles_post_ra>
// kernel: tpu_custom_call.1
= control target key start
LH: loop header
LB: loop body
LE: loop exit
PB: predicated region body
PF: predicated region fallthrough
CT: control target
= control target key end

     0   :  { %vm54_vm0 = vcmask 261120   ;;  %s1178_s0 = inlined_call_operand.vmem [shape: f32[128,32], index: 0, kind: input, shape index: {}]   ;;  %s1179_s1 = inlined_call_operand.vmem [shape: f32[32,64], index: 1, kind: input, shape index: {}]   ;;  %s1180_s2 = inlined_call_operand.vmem [shape: f32[1,64], index: 2, kind: input, shape index: {}]   ;;  %s1181_s3 = inlined_call_operand.vmem [shape: f32[64,64], index: 3, kind: input, shape index: {}]   ;;  %s1182_s4 = inlined_call_operand.vmem [shape: f32[1,64], index: 4, kind: input, shape index: {}]   ;;  %s1183_s5 = inlined_call_operand.vmem [shape: f32[8,64], index: 5, kind: input, shape index: {}]   ;;  %s1184_s6 = inlined_call_operand.vmem [shape: f32[8,1], index: 6, kind: input, shape index: {}]   ;;  %s1185_s7 = inlined_call_operand.hbm [shape: f32[2,128], index: 7, kind: output, shape index: {}]  }
   0x1   :  { %v43_v0 = vld [vmem:[%s1179_s1] sm:$0xff]  ;;  %v44_v1 = vld [vmem:[%s1179_s1 + $0x8] sm:$0xff]  ;;  %v45_v2 = vld [vmem:[%s1179_s1 + $0x10] sm:$0xff] }
   0x2   :  { %v872_v3 = vpack.c.bf16 %v44_v1, %v43_v0  ;;  %v46_v4 = vld [vmem:[%s1179_s1 + $0x18] sm:$0xff]  ;;  %v27_v5 = vld [vmem:[%s1178_s0] sm:$0xff]  ;;  %v265_v8 = vld [vmem:[%s1181_s3 + $0x8] sm:$0xff] }
   0x3   :  { %v876_v6 = vpack.c.bf16 %v46_v4, %v45_v2  ;;  %773 = vmatprep.mubr.msk.f32.mxu1 %vm54_vm0, %v27_v5  ;;  %v264_v7 = vld [vmem:[%s1181_s3] sm:$0xff]  ;;  %v266_v9 = vld [vmem:[%s1181_s3 + $0x10] sm:$0xff]  ;;  %v267_v10 = vld [vmem:[%s1181_s3 + $0x18] sm:$0xff] }
   0x4   :  { %873 = vmatprep.subr.bf16.mxu1 %v872_v3  ;;  %v28_v11 = vld [vmem:[%s1178_s0 + $0x8] sm:$0xff]  ;;  %v880_v12 = vpack.c.bf16 %v265_v8, %v264_v7  ;;  %v29_v13 = vld [vmem:[%s1178_s0 + $0x10] sm:$0xff]  ;;  %v884_v14 = vpack.c.bf16 %v267_v10, %v266_v9 }
   0x5   :  { %875 = vmatpush3.bf16.msra.mxu1 %v872_v3 }
   0x6   :  { %877 = vmatprep.subr.bf16.mxu1 %v876_v6 }
   0x9   :  { %879 = vmatpush3.bf16.msra.mxu1 %v876_v6 }
   0xa   :  { %12 = vsyncpa [#allocation3], 0  ;;  %881 = vmatprep.subr.bf16.mxu1 %v880_v12  ;;  %v268_v15 = vld [vmem:[%s1181_s3 + $0x20] sm:$0xff]  ;;  %v269_v16 = vld [vmem:[%s1181_s3 + $0x28] sm:$0xff]  ;;  %vm279_vm1 = vcmask 523264   ;;  %vm963_vm2 = vmmov 0  }
   0xb   :  { %v30_v17 = vld [vmem:[%s1178_s0 + $0x18] sm:$0xff]  ;;  %v31_v18 = vld [vmem:[%s1178_s0 + $0x20] sm:$0xff]  ;;  %v888_v19 = vpack.c.bf16 %v269_v16, %v268_v15  ;;  %v270_v20 = vld [vmem:[%s1181_s3 + $0x30] sm:$0xff] }
   0xc   :  { %774 = vmatmul.mubr.msk.f32.vlgmr.msra.gmra.mrb[0].mxu1 %vm54_vm0, %v28_v11  ;;  %v271_v21 = vld [vmem:[%s1181_s3 + $0x38] sm:$0xff]  ;;  %v32_v22 = vld [vmem:[%s1178_s0 + $0x28] sm:$0xff]  ;;  %v33_v23 = vld [vmem:[%s1178_s0 + $0x30] sm:$0xff] }
   0xd   :  { %776 = vmatprep.mubr.msk.f32.mxu1 %vm54_vm0, %v29_v13  ;;  %883 = vmatpush3.bf16.msra.mxu1 %v880_v12  ;;  %v892_v24 = vpack.c.bf16 %v271_v21, %v270_v20  ;;  %v34_v25 = vld [vmem:[%s1178_s0 + $0x38] sm:$0xff]  ;;  %v35_v26 = vld [vmem:[%s1178_s0 + $0x40] sm:$0xff]  ;;  %v36_v27 = vld [vmem:[%s1178_s0 + $0x48] sm:$0xff]  ;;  %v964_v20 = vmov 0.0  }
   0xe   :  { %885 = vmatprep.subr.bf16.mxu1 %v884_v14  ;;  %v37_v28 = vld [vmem:[%s1178_s0 + $0x50] sm:$0xff]  ;;  %v38_v29 = vld [vmem:[%s1178_s0 + $0x58] sm:$0xff]  ;;  %v39_v30 = vld [vmem:[%s1178_s0 + $0x60] sm:$0xff]  ;;  %869 = vmatprep.mubr.msk.f32.mxu0 %vm963_vm2, %v964_v20 }
   0xf   :  { %v40_v31 = vld [vmem:[%s1178_s0 + $0x68] sm:$0xff]  ;;  %v41_v32 = vld [vmem:[%s1178_s0 + $0x70] sm:$0xff]  ;;  %v42_v33 = vld [vmem:[%s1178_s0 + $0x78] sm:$0xff] }
  0x10   :  { %777 = vmatmul.mubr.msk.f32.gmra.mrb[2].mxu1 %vm54_vm0, %v30_v17  ;;  %v653_v34 = vld [vmem:[%s1180_s2] ss:$0 sm:$0xff]  ;;  %vm1135_vm3 = vmpackc.low %vm279_vm1, %vm279_vm1 }
  0x11   :  { %779 = vmatprep.mubr.msk.f32.mxu1 %vm54_vm0, %v31_v18  ;;  %887 = vmatpush3.bf16.msra.mxu1 %v884_v14  ;;  %v490_v21 = vld [vmem:[%s1184_s6] sm:$0xff] }
  0x12   :  { %889 = vmatprep.subr.bf16.mxu1 %v888_v19 }
  0x14   :  { %780 = vmatmul.mubr.msk.f32.gmra.mrb[4].mxu1 %vm54_vm0, %v32_v22  ;;  %v965_v22 = vmov 0  }
  0x15   :  { %782 = vmatprep.mubr.msk.f32.mxu1 %vm54_vm0, %v33_v23  ;;  %891 = vmatpush3.bf16.msra.mxu1 %v888_v19  ;;  %v962_v19 = vmov 0.0|0.0   ;;  %v670_v23 = vld [vmem:[%s1182_s4] ss:$0 sm:$0xff] }
  0x16   :  { %893 = vmatprep.subr.bf16.mxu1 %v892_v24  ;;  %896 = vmatprep.subr.bf16.mxu0 %v962_v19 }
  0x17   :  { %933 = vset.pattern.permute.xlu0 %v965_v22 }
  0x18   :  { %783 = vmatmul.mubr.msk.f32.gmra.mrb[6].mxu1 %vm54_vm0, %v34_v25  ;;  %493 = vperm.xlu0 %933, %v490_v21  }
  0x19   :  { %785 = vmatprep.mubr.msk.f32.mxu1 %vm54_vm0, %v35_v26  ;;  %895 = vmatpush3.bf16.msra.mxu1 %v892_v24 }
  0x1c   :  { %786 = vmatmul.mubr.msk.f32.gmra.mrb[8].mxu1 %vm54_vm0, %v36_v27 }
  0x1d   :  { %788 = vmatprep.mubr.msk.f32.mxu1 %vm54_vm0, %v37_v28 }
  0x20   :  { %789 = vmatmul.mubr.msk.f32.gmra.mrb[10].mxu1 %vm54_vm0, %v38_v29 }
  0x21   :  { %791 = vmatprep.mubr.msk.f32.mxu1 %vm54_vm0, %v39_v30 }
  0x24   :  { %792 = vmatmul.mubr.msk.f32.gmra.mrb[12].mxu1 %vm54_vm0, %v40_v31 }
  0x25   :  { %794 = vmatprep.mubr.msk.f32.mxu1 %vm54_vm0, %v41_v32 }
  0x28   :  { %795 = vmatmul.mubr.msk.f32.gmra.mrb[14].mxu1 %vm54_vm0, %v42_v33 }
  0xdf   :  { %v775_v35 = vpop.f32.mrb[0].mxu1 }
  0xe0   :  { %v175_v36 = vadd.f32 %v775_v35, %v653_v34  ;;  %v169_v37 = vpop.f32.mrb[1].mxu1 }
  0xe1   :  { %v170_v38 = vadd.f32 %v653_v34, %v169_v37 }
  0xe2   :  { %v249_v41 = vmax.f32 %v175_v36, 0.0 }
  0xe3   :  { %v248_v39 = vmax.f32 %v170_v38, 0.0  ;;  %v778_v40 = vpop.f32.mrb[2].mxu1 }
  0xe4   :  { %v185_v42 = vadd.f32 %v778_v40, %v653_v34  ;;  %v179_v43 = vpop.f32.mrb[3].mxu1 }
  0xe5   :  { %v180_v44 = vadd.f32 %v653_v34, %v179_v43  ;;  %813 = vmatprep.mubr.msk.f32.mxu1 %vm279_vm1, %v248_v39 }
  0xe6   :  { %v251_v45 = vmax.f32 %v185_v42, 0.0  ;;  %814 = vmatmul.mubr.msk.f32.vlgmr.msra.gmra.mrb[16].mxu1 %vm279_vm1, %v249_v41 }
  0xe7   :  { %v250_v46 = vmax.f32 %v180_v44, 0.0  ;;  %v781_v47 = vpop.f32.mrb[4].mxu1 }
  0xe8   :  { %v195_v48 = vadd.f32 %v781_v47, %v653_v34  ;;  %v189_v49 = vpop.f32.mrb[5].mxu1 }
  0xe9   :  { %816 = vmatprep.mubr.msk.f32.mxu1 %vm279_vm1, %v250_v46  ;;  %v190_v50 = vadd.f32 %v653_v34, %v189_v49 }
  0xea   :  { %817 = vmatmul.mubr.msk.f32.gmra.mrb[18].mxu1 %vm279_vm1, %v251_v45  ;;  %v253_v51 = vmax.f32 %v195_v48, 0.0 }
  0xeb   :  { %v252_v52 = vmax.f32 %v190_v50, 0.0  ;;  %v784_v53 = vpop.f32.mrb[6].mxu1 }
  0xec   :  { %v205_v54 = vadd.f32 %v784_v53, %v653_v34  ;;  %v199_v55 = vpop.f32.mrb[7].mxu1 }
  0xed   :  { %819 = vmatprep.mubr.msk.f32.mxu1 %vm279_vm1, %v252_v52  ;;  %v200_v56 = vadd.f32 %v653_v34, %v199_v55 }
  0xee   :  { %820 = vmatmul.mubr.msk.f32.gmra.mrb[20].mxu1 %vm279_vm1, %v253_v51  ;;  %v255_v57 = vmax.f32 %v205_v54, 0.0 }
  0xef   :  { %v254_v58 = vmax.f32 %v200_v56, 0.0  ;;  %v787_v59 = vpop.f32.mrb[8].mxu1 }
  0xf0   :  { %v215_v60 = vadd.f32 %v787_v59, %v653_v34  ;;  %v209_v61 = vpop.f32.mrb[9].mxu1 }
  0xf1   :  { %822 = vmatprep.mubr.msk.f32.mxu1 %vm279_vm1, %v254_v58  ;;  %v210_v62 = vadd.f32 %v653_v34, %v209_v61 }
  0xf2   :  { %823 = vmatmul.mubr.msk.f32.gmra.mrb[22].mxu1 %vm279_vm1, %v255_v57  ;;  %v257_v63 = vmax.f32 %v215_v60, 0.0 }
  0xf3   :  { %v256_v0 = vmax.f32 %v210_v62, 0.0  ;;  %v790_v1 = vpop.f32.mrb[10].mxu1 }
  0xf4   :  { %v225_v2 = vadd.f32 %v790_v1, %v653_v34  ;;  %v219_v3 = vpop.f32.mrb[11].mxu1 }
  0xf5   :  { %825 = vmatprep.mubr.msk.f32.mxu1 %vm279_vm1, %v256_v0  ;;  %v220_v4 = vadd.f32 %v653_v34, %v219_v3 }
  0xf6   :  { %826 = vmatmul.mubr.msk.f32.gmra.mrb[24].mxu1 %vm279_vm1, %v257_v63  ;;  %v259_v5 = vmax.f32 %v225_v2, 0.0 }
  0xf7   :  { %v258_v6 = vmax.f32 %v220_v4, 0.0  ;;  %v793_v7 = vpop.f32.mrb[12].mxu1 }
  0xf8   :  { %v235_v8 = vadd.f32 %v793_v7, %v653_v34  ;;  %v229_v9 = vpop.f32.mrb[13].mxu1 }
  0xf9   :  { %828 = vmatprep.mubr.msk.f32.mxu1 %vm279_vm1, %v258_v6  ;;  %v230_v10 = vadd.f32 %v653_v34, %v229_v9 }
  0xfa   :  { %829 = vmatmul.mubr.msk.f32.gmra.mrb[26].mxu1 %vm279_vm1, %v259_v5  ;;  %v261_v11 = vmax.f32 %v235_v8, 0.0 }
  0xfb   :  { %v260_v12 = vmax.f32 %v230_v10, 0.0  ;;  %v796_v13 = vpop.f32.mrb[14].mxu1 }
  0xfc   :  { %v245_v14 = vadd.f32 %v796_v13, %v653_v34  ;;  %v239_v15 = vpop.f32.mrb[15].mxu1 }
  0xfd   :  { %831 = vmatprep.mubr.msk.f32.mxu1 %vm279_vm1, %v260_v12  ;;  %v240_v16 = vadd.f32 %v653_v34, %v239_v15 }
  0xfe   :  { %832 = vmatmul.mubr.msk.f32.gmra.mrb[28].mxu1 %vm279_vm1, %v261_v11  ;;  %v263_v17 = vmax.f32 %v245_v14, 0.0 }
  0xff   :  { %v262_v18 = vmax.f32 %v240_v16, 0.0 }
 0x101   :  { %834 = vmatprep.mubr.msk.f32.mxu1 %vm279_vm1, %v262_v18  ;;  %v494_v18 = vpop.permute.xlu0 %493 }
 0x102   :  { %835 = vmatmul.mubr.msk.f32.gmra.mrb[30].mxu1 %vm279_vm1, %v263_v17  ;;  %v489_v17 = vld [vmem:[%s1183_s5] sm:$0xff]  ;;  %s966_s5 = smov [#allocation2]  }
 0x103   :  { %s645_s12 = sshll.u32 %s966_s5, 4  ;;  %s646_s12 = int_to_ptr.vmem [resolvable:$true] %s645_s12 }
 0x104   :  { %s938_s13 = scalar_lea.vmem %s646_s12, 32  ;;  %p943_p1 = scmp.lt.s32.totalorder %s646_s12, %s646_s12 }
 0x105   :  { %p939_p0 = scmp.ne.s32.totalorder %s646_s12, %s938_s13  ;;  %p944_p2 = scmp.lt.s32.totalorder %s938_s13, %s938_s13 }
 0x107   :  { %p945_p3 = por %p944_p2, %p943_p1 }
 0x109   :  { %p946_p4 = pnand %p945_p3, %p939_p0 }
 0x1b9   :  { %v815_v24 = vpop.f32.mrb[16].mxu1 }
 0x1ba   :  { %v400_v25 = vadd.f32 %v815_v24, %v670_v23  ;;  %v394_v26 = vpop.f32.mrb[17].mxu1 }
 0x1bb   :  { %v395_v27 = vadd.f32 %v670_v23, %v394_v26 }
 0x1bc   :  { %v474_v28 = vmax.f32 %v400_v25, 0.0 }
 0x1bd   :  { %v473_v29 = vmax.f32 %v395_v27, 0.0  ;;  %v818_v30 = vpop.f32.mrb[18].mxu1 }
 0x1be   :  { %v410_v31 = vadd.f32 %v818_v30, %v670_v23  ;;  %v404_v32 = vpop.f32.mrb[19].mxu1 }
 0x1bf   :  { %v897_v34 = vpack.c.bf16 %v474_v28, %v473_v29  ;;  %v405_v35 = vadd.f32 %v670_v23, %v404_v32 }
 0x1c0   :  { %v476_v36 = vmax.f32 %v410_v31, 0.0 }
 0x1c1   :  { %v475_v37 = vmax.f32 %v405_v35, 0.0  ;;  %899 = vmatpush3.bf16.xpose.msk.msra.mxu0 %vm1135_vm3, %v897_v34  ;;  %v821_v38 = vpop.f32.mrb[20].mxu1 }
 0x1c2   :  { %v420_v39 = vadd.f32 %v821_v38, %v670_v23  ;;  %v414_v40 = vpop.f32.mrb[21].mxu1  ;;  %900 = vmatprep.subr.bf16.mxu0 %v962_v19 }
 0x1c3   :  { %v901_v41 = vpack.c.bf16 %v476_v36, %v475_v37  ;;  %v415_v42 = vadd.f32 %v670_v23, %v414_v40 }
 0x1c4   :  { %v478_v43 = vmax.f32 %v420_v39, 0.0 }
 0x1c5   :  { %v477_v44 = vmax.f32 %v415_v42, 0.0  ;;  %v824_v45 = vpop.f32.mrb[22].mxu1 }
 0x1c6   :  { %v430_v46 = vadd.f32 %v824_v45, %v670_v23  ;;  %v424_v47 = vpop.f32.mrb[23].mxu1 }
 0x1c7   :  { %v905_v48 = vpack.c.bf16 %v478_v43, %v477_v44  ;;  %v425_v49 = vadd.f32 %v670_v23, %v424_v47 }
 0x1c8   :  { %v480_v50 = vmax.f32 %v430_v46, 0.0 }
 0x1c9   :  { %903 = vmatpush3.bf16.xpose.msk.msra.mxu0 %vm1135_vm3, %v901_v41  ;;  %v479_v51 = vmax.f32 %v425_v49, 0.0  ;;  %v827_v52 = vpop.f32.mrb[24].mxu1 }
 0x1ca   :  { %904 = vmatprep.subr.bf16.mxu0 %v962_v19  ;;  %v440_v53 = vadd.f32 %v827_v52, %v670_v23  ;;  %v434_v54 = vpop.f32.mrb[25].mxu1 }
 0x1cb   :  { %v909_v55 = vpack.c.bf16 %v480_v50, %v479_v51  ;;  %v435_v56 = vadd.f32 %v670_v23, %v434_v54 }
 0x1cc   :  { %v482_v57 = vmax.f32 %v440_v53, 0.0 }
 0x1cd   :  { %v481_v58 = vmax.f32 %v435_v56, 0.0  ;;  %v830_v59 = vpop.f32.mrb[26].mxu1 }
 0x1ce   :  { %v450_v60 = vadd.f32 %v830_v59, %v670_v23  ;;  %v444_v61 = vpop.f32.mrb[27].mxu1 }
 0x1cf   :  { %v913_v62 = vpack.c.bf16 %v482_v57, %v481_v58  ;;  %v445_v63 = vadd.f32 %v670_v23, %v444_v61 }
 0x1d0   :  { %v484_v0 = vmax.f32 %v450_v60, 0.0 }
 0x1d1   :  { %907 = vmatpush3.bf16.xpose.msk.msra.mxu0 %vm1135_vm3, %v905_v48  ;;  %v483_v1 = vmax.f32 %v445_v63, 0.0  ;;  %v833_v2 = vpop.f32.mrb[28].mxu1 }
 0x1d2   :  { %908 = vmatprep.subr.bf16.mxu0 %v962_v19  ;;  %v460_v3 = vadd.f32 %v833_v2, %v670_v23  ;;  %v454_v4 = vpop.f32.mrb[29].mxu1 }
 0x1d3   :  { %v917_v5 = vpack.c.bf16 %v484_v0, %v483_v1  ;;  %v455_v6 = vadd.f32 %v670_v23, %v454_v4 }
 0x1d4   :  { %v486_v7 = vmax.f32 %v460_v3, 0.0 }
 0x1d5   :  { %v485_v8 = vmax.f32 %v455_v6, 0.0  ;;  %v836_v9 = vpop.f32.mrb[30].mxu1 }
 0x1d6   :  { %v470_v10 = vadd.f32 %v836_v9, %v670_v23  ;;  %v464_v11 = vpop.f32.mrb[31].mxu1 }
 0x1d7   :  { %v921_v12 = vpack.c.bf16 %v486_v7, %v485_v8  ;;  %v465_v13 = vadd.f32 %v670_v23, %v464_v11 }
 0x1d8   :  { %v488_v14 = vmax.f32 %v470_v10, 0.0 }
 0x1d9   :  { %911 = vmatpush3.bf16.xpose.msk.msra.mxu0 %vm1135_vm3, %v909_v55  ;;  %v487_v15 = vmax.f32 %v465_v13, 0.0 }
 0x1da   :  { %912 = vmatprep.subr.bf16.mxu0 %v962_v19 }
 0x1db   :  { %v925_v16 = vpack.c.bf16 %v488_v14, %v487_v15 }
 0x1e1   :  { %915 = vmatpush3.bf16.xpose.msk.msra.mxu0 %vm1135_vm3, %v913_v62 }
 0x1e2   :  { %916 = vmatprep.subr.bf16.mxu0 %v962_v19 }
 0x1e9   :  { %919 = vmatpush3.bf16.xpose.msk.msra.mxu0 %vm1135_vm3, %v917_v5 }
 0x1ea   :  { %920 = vmatprep.subr.bf16.mxu0 %v962_v19 }
 0x1f1   :  { %923 = vmatpush3.bf16.xpose.msk.msra.mxu0 %vm1135_vm3, %v921_v12 }
 0x1f2   :  { %924 = vmatprep.subr.bf16.mxu0 %v962_v19 }
 0x1f9   :  { %927 = vmatpush3.bf16.xpose.msk.msra.mxu0 %vm1135_vm3, %v925_v16 }
 0x200   :  { %870 = vmatmul.mubr.msk.f32.vlgmr.msra.gmra.mrb[0].mxu0 %vm279_vm1, %v489_v17 }
 0x2d3   :  { %v613_v20 = vpop.f32.mrb[0].mxu0 }
 0x2d4   :  { %v614_v21 = vadd.f32 %v613_v20, %v494_v18  ;;  %v871_v22 = vpop.f32.mrb[1].mxu0 }
 0x2d6   :  { %v617_v23 = vand.u32 2147483647, %v614_v21  ;;  %v634_v29 = vsub.f32 0.0, %v614_v21  ;;  %v630_v34 = vmax.f32 %v614_v21, 0.0 }
 0x2d8   :  { %v618_v24 = vsub.f32 0.0, %v617_v23  ;;  %v635_v35 = vmax.f32 %v634_v29, 0.0 }
 0x2da   :  { %v619_v25 = vmul.f32 1.442695, %v618_v24 }
 0x2dc   :  { %934 = vpow2.f32 %v619_v25 }
 0x2e6   :  { %v935_v26 = vpop.eup %934 }
 0x2e7   :  { %v621_v27 = vadd.f32 1.0, %v935_v26  ;;  %v624_v19 = vmul.f32 -0.5, %v935_v26  ;;  %v627_v30 = vand.u32 2147483647, %v935_v26 }
 0x2e9   :  { %936 = vlog2.f32 %v621_v27  ;;  %v625_v28 = vadd.f32 1.0, %v624_v19  ;;  %vm628_vm4 = vcmp.lt.f32.partialorder %v627_v30, 0.0004427343 }
 0x2eb   :  { %v626_v33 = vmul.f32 %v935_v26, %v625_v28 }
 0x2f3   :  { %v937_v31 = vpop.eup %936 }
 0x2f4   :  { %v623_v32 = vmul.f32 0.6931472, %v937_v31 }
 0x2f6   :  { %v629_v36 = vsel %vm628_vm4, %v626_v33, %v623_v32 }
 0x2f7   :  { %v631_v37 = vadd.f32 %v630_v34, %v629_v36  ;;  %v636_v38 = vadd.f32 %v635_v35, %v629_v36 }
 0x2f9   :  { %v632_v39 = vsub.f32 0.0, %v631_v37  ;;  %v637_v40 = vsub.f32 0.0, %v636_v38 }
 0x2fb   :  { %633 = vst [vmem:[#allocation2] sm:$0x1] %v632_v39  ;;  %638 = vst [vmem:[#allocation2 + $0x1] sm:$0x1] %v637_v40 }
 0x2fc   :  { %949 = shalt.err (!%p946_p4)
}
 0x2fd   :  { %s950_s15 = scalar_lea.hbm %s1185_s7, 32 }
 0x2fe   :  { %p951_p5 = scmp.ne.s32.totalorder %s1185_s7, %s950_s15  ;;  %p954_p6 = scmp.lt.u32.totalorder %s950_s15, %s1185_s7 }
 0x300   :  { %p956_p7 = pnand %p954_p6, %p951_p5 }
 0x302   :  { %959 = shalt.err (!%p956_p7)
}
 0x303   :  { %648 = dma.vmem_to_hbm [thread:$0]  %s646_s12, 32, %s1185_s7, [#allocation3]  }
 0x304   :  { %960 = dma.done.wait [#allocation3], 32  }
 0x305   :  { %961 = vsyncadd [#allocation3], 4294967264 }
 0x306   :  { %652 = vsyncpa [#allocation3], 1 }

</bundles_post_ra>
